<compile_context>
chip_gen: v5e
topology: v5e:2x2
jax: 0.10.0
libtpu: 0.0.40
codegen_flags: <defaults>
</compile_context>

<pallas_src>
import jax
import jax.numpy as jnp
from jax.experimental import pallas as pl
from jax.experimental.pallas import tpu as pltpu


def _identity_kernel(x_ref, o_ref):
    # Identity: copy the current tile through VMEM.
    o_ref[...] = x_ref[...]


_LANE_CANDIDATES = (4096, 2048, 1024, 512, 256, 128)


def _lane_dense_slab(n):
    """Pick (rows, lanes) with lanes a large multiple of 128, preferring rows >= 8.

    Returns None if n is not a multiple of 128 (caller short-circuits).
    """
    best = None
    for lanes in _LANE_CANDIDATES:
        if n % lanes == 0:
            if best is None:
                best = (n // lanes, lanes)
            if n // lanes >= 8:
                return n // lanes, lanes
    return best


def _target_tile_bytes():
    """~8 MiB tiles on v7x (fast HBM amortizes per-step overhead), ~4 MiB elsewhere."""
    try:
        kind = jax.devices()[0].device_kind.lower()
    except Exception:  # pragma: no cover - defensive; default is fine everywhere
        kind = ""
    if "v7" in kind or "7x" in kind:
        return 8 * 1024 * 1024
    return 4 * 1024 * 1024


def _round_up(v, m):
    return ((v + m - 1) // m) * m


def hook_point_forward(x: jax.Array, *, materialize: bool = False) -> jax.Array:
    """Pallas equivalent of HookPoint.forward(x) == x.

    Default: returns x unchanged with no kernel launch (an identity forward is
    pure bookkeeping — launching an opaque custom call would only add a full
    2xN HBM round-trip).  Pass materialize=True to force a distinct output
    buffer produced by a tiled Pallas copy kernel.
    """
    # TODO(synk): PyTorch forward/backward hook registration (add_hook /
    # remove_hooks / give_name) is host-side bookkeeping with no Pallas
    # equivalent; only the identity forward is implemented.
    if not materialize:
        return x

    orig_shape = x.shape
    n = x.size
    if n == 0:
        return x

    slab = _lane_dense_slab(n)
    if slab is None:
        # Element count not a multiple of 128: padding + slicing would cost
        # more HBM traffic than the copy itself; identity semantics allow
        # returning x directly.
        return x

    R, C = slab
    itemsize = jnp.dtype(x.dtype).itemsize
    x2d = x.reshape(R, C)

    tile_bytes = _target_tile_bytes()
    # Row tile targeting ~tile_bytes per block; lane dim is always the full
    # slab width (no masked partial stores).  32-sublane alignment keeps
    # sub-32-bit dtypes (bf16 / int8 / fp8) on their packed-row layout.
    rows_target = max(32, (tile_bytes // max(1, C * itemsize)) // 32 * 32)

    if R > rows_target:
        tr = rows_target
    elif R >= 64:
        # Force at least 2 blocks for medium arrays so the "parallel" grid
        # axis can shard across v7x's two TensorCores.
        tr = min(R, _round_up((R + 1) // 2, 32))
    else:
        tr = R

    grid = (pl.cdiv(R, tr),)

    out = pl.pallas_call(
        _identity_kernel,
        out_shape=jax.ShapeDtypeStruct((R, C), x2d.dtype),
        grid=grid,
        in_specs=[pl.BlockSpec((tr, C), lambda i: (i, 0))],
        out_specs=pl.BlockSpec((tr, C), lambda i: (i, 0)),
        cost_estimate=pl.CostEstimate(
            flops=0,
            transcendentals=0,
            bytes_accessed=2 * R * C * itemsize,
        ),
        compiler_params=pltpu.CompilerParams(
            dimension_semantics=("parallel",),
            # 2 double-buffered blocks each for input and output, plus headroom;
            # comfortably under v7x's 64 MiB physical VMEM per TC.
            vmem_limit_bytes=4 * tile_bytes + (4 * 1024 * 1024),
        ),
    )(x2d)

    return out.reshape(orig_shape)


if __name__ == "__main__":
    # HookPoint has no parameters; nothing to initialize.
    key = jax.random.PRNGKey(0)
    # Shape consistent with a typical wrapped activation, NCHW-style.
    x = jax.random.normal(key, (2, 4, 16, 16), dtype=jnp.float32)

    # Default path: true identity, no kernel launch.
    y = hook_point_forward(x)
    jax.block_until_ready(y)
    assert y.shape == x.shape and y.dtype == x.dtype
    assert bool(jnp.all(y == x))

    # Materialized path: exercises the Pallas copy kernel once.
    y_copy = hook_point_forward(x, materialize=True)
    jax.block_until_ready(y_copy)
    assert y_copy.shape == x.shape and y_copy.dtype == x.dtype
    assert bool(jnp.all(y_copy == x))

    # Awkward (non-multiple-of-128) size: short-circuits, no pad/slice traffic.
    z = jax.random.normal(jax.random.PRNGKey(1), (3, 5, 7), dtype=jnp.bfloat16)
    w = hook_point_forward(z, materialize=True)
    jax.block_until_ready(w)
    assert w.shape == z.shape and w.dtype == z.dtype
    assert bool(jnp.all(w == z))

    print("KERNEL_OK")
</pallas_src>

<mosaic_0001>
module attributes {stable_mosaic.version = 11 : i64} {
  func.func @_identity_kernel(%arg0: i32, %arg1: memref<8x256xf32, #tpu.memory_space<vmem>>, %arg2: memref<8x256xf32, #tpu.memory_space<vmem>>) attributes {dimension_semantics = [#tpu.dimension_semantics<parallel>], iteration_bounds = array<i64: 1>, scalar_prefetch = 0 : i64, scratch_operands = 0 : i64, tpu.core_type = #tpu.core_type<tc>, window_params = [{transform_indices = @transform_0, window_bounds = array<i64: 8, 256>}, {transform_indices = @transform_1, window_bounds = array<i64: 8, 256>}]} {
    %c0 = arith.constant 0 : index
    %c0_0 = arith.constant 0 : index
    %0 = vector.load %arg1[%c0, %c0_0] : memref<8x256xf32, #tpu.memory_space<vmem>>, vector<8x256xf32>
    %c0_1 = arith.constant 0 : index
    %c0_2 = arith.constant 0 : index
    %1 = vector.load %arg2[%c0_1, %c0_2] : memref<8x256xf32, #tpu.memory_space<vmem>>, vector<8x256xf32>
    tpu.vector_store %arg2[%c0_1, %c0_2], %0 {strides = array<i32>} : memref<8x256xf32, #tpu.memory_space<vmem>>, vector<8x256xf32>,
    return
  }
  func.func @transform_0(%arg0: i32) -> (i32, i32) {
    %c0_i32 = arith.constant 0 : i32
    %c0_i32_0 = arith.constant 0 : i32
    return %arg0, %c0_i32 : i32, i32
  }
  func.func @transform_1(%arg0: i32) -> (i32, i32) {
    %c0_i32 = arith.constant 0 : i32
    %c0_i32_0 = arith.constant 0 : i32
    return %arg0, %c0_i32 : i32, i32
  }
}

</mosaic_0001>

<bundles_post_ra>
// kernel: tpu_custom_call.1
= control target key start
LH: loop header
LB: loop body
LE: loop exit
PB: predicated region body
PF: predicated region fallthrough
CT: control target
= control target key end

     0   :  { %6 = vsyncpa [#allocation3], 0  ;;  %s116_s0 = inlined_call_operand.hbm [shape: f32[8,256], index: 0, kind: input, shape index: {}]   ;;  %s117_s1 = inlined_call_operand.hbm [shape: f32[8,256], index: 1, kind: output, shape index: {}]  }
   0x1   :  { %7 = vsyncpa [#allocation4], 0  ;;  %s13_s8 = sshll.u32 %s116_s0, 4  ;;  %s98_s9 = smov [#allocation2]   ;;  %s14_s8 = int_to_ptr.hbm [resolvable:$true] %s13_s8 }
   0x2   :  { %s15_s10 = sshll.u32 %s98_s9, 4  ;;  %s16_s10 = int_to_ptr.vmem [resolvable:$true] %s15_s10 }
   0x3   :  { %18 = dma.hbm_to_vmem [thread:$0]  %s14_s8, 256, %s16_s10, [#allocation3]  }
   0x4   :  { %94 = dma.done.wait [#allocation3], 256  }
   0x5   :  { %95 = vsyncadd [#allocation3], 4294967040  ;;  %s99_s11 = smov [#allocation5]   ;;  %s34_s15 = sshll.u32 %s117_s1, 4  ;;  %v23_v0 = vld [vmem:[#allocation2] sm:$0xff]  ;;  %v24_v1 = vld [vmem:[#allocation2 + $0x8] sm:$0xff]  ;;  %s35_s15 = int_to_ptr.hbm [resolvable:$true] %s34_s15 }
   0x6   :  { %s32_s12 = sshll.u32 %s99_s11, 4  ;;  %25 = vst [vmem:[#allocation5] sm:$0xff] %v23_v0  ;;  %s33_s12 = int_to_ptr.vmem [resolvable:$true] %s32_s12 }
   0x7   :  { %26 = vst [vmem:[#allocation5 + $0x8] sm:$0xff] %v24_v1 }
   0x8   :  { %37 = dma.vmem_to_hbm [thread:$0]  %s33_s12, 256, %s35_s15, [#allocation4]  }
   0x9   :  { %96 = dma.done.wait [#allocation4], 256  }
   0xa   :  { %97 = vsyncadd [#allocation4], 4294967040 }
   0xb   :  { %42 = vsyncpa [#allocation3], 1 }
   0xc   :  { %43 = vsyncpa [#allocation4], 1 }

</bundles_post_ra>
